<compile_context>
chip_gen: v7x
topology: tpu7x:2x2x1
jax: 0.10.0
libtpu: 0.0.40
codegen_flags: <defaults>
</compile_context>

<pallas_src>
import functools

import jax
import jax.numpy as jnp
from jax import lax
from jax.experimental import pallas as pl
from jax.experimental.pallas import tpu as pltpu


def _shift(x, off, mask):
    """y[:, n] = x[:, n + off] where mask is True, else 0.

    Implemented as an XLU lane rotation (pltpu.roll); the wrapped lanes are
    exactly the out-of-range lanes and are zeroed by the select mask.
    """
    n = x.shape[-1]
    rolled = pltpu.roll(x, (-off) % n, axis=1)
    return jnp.where(mask, rolled, 0.0)


def _conv3(x, wcat, off, m_neg, m_pos, channels):
    """Factorized 3-tap conv (along H or W) as one K=3C MXU matmul.

    wcat: (C, 3C) = [W_center | W_tap0 | W_tap2] stacked along the Cin axis.
    off : flat lane offset of one tap step (d*W for the H conv, d for the W conv).
    """
    xn = _shift(x, -off, m_neg)   # input for tap k=0 (reads h-d / w-d)
    xp = _shift(x, off, m_pos)    # input for tap k=2 (reads h+d / w+d)
    if channels % 8 == 0:
        xcat = jnp.concatenate([x, xn, xp], axis=0)            # (3C, HW)
        return jnp.dot(wcat, xcat, preferred_element_type=jnp.float32)
    # Fallback for sublane-unaligned C: three K=C matmuls (still roll-based shifts).
    c = channels
    acc = jnp.dot(wcat[:, :c], x, preferred_element_type=jnp.float32)
    acc = acc + jnp.dot(wcat[:, c:2 * c], xn, preferred_element_type=jnp.float32)
    return acc + jnp.dot(wcat[:, 2 * c:], xp, preferred_element_type=jnp.float32)


def _nb1d_kernel(widx_ref, hidx_ref, x_ref,
                 wh1_ref, ww1_ref, wh2_ref, ww2_ref, pv_ref,
                 o_ref, *, channels, height, width, dilated):
    x = x_ref[...]                     # (C, H*W) channels on sublanes, HW on lanes
    w_co = widx_ref[...]               # (1, H*W) int32 w coordinate of each lane
    h_co = hidx_ref[...]               # (1, H*W) int32 h coordinate of each lane

    # Boundary masks, hoisted once (vselect later; no int->float convert + mul).
    mh_n1 = h_co >= 1
    mh_p1 = h_co < height - 1
    mw_n1 = w_co >= 1
    mw_p1 = w_co < width - 1
    mh_nd = h_co >= dilated
    mh_pd = h_co < height - dilated
    mw_nd = w_co >= dilated
    mw_pd = w_co < width - dilated

    pv = pv_ref[...]                   # (C, 8) packed per-channel params
    b1 = pv[:, 0:1]                    # conv3x1_1 bias
    b3 = pv[:, 1:2]                    # conv3x1_2 bias
    s1 = pv[:, 2:3]                    # bn1 scale
    t1 = pv[:, 3:4]                    # bn1 shift (conv1x3_1 bias folded in)
    s2 = pv[:, 4:5]                    # bn2 scale
    t2 = pv[:, 5:6]                    # bn2 shift (conv1x3_2 bias folded in)

    wh1 = wh1_ref[...]
    ww1 = ww1_ref[...]
    wh2 = wh2_ref[...]
    ww2 = ww2_ref[...]

    y = _conv3(x, wh1, width, mh_n1, mh_p1, channels) + b1             # conv3x1_1
    y = jnp.maximum(y, 0.0)                                            # relu
    y = _conv3(y, ww1, 1, mw_n1, mw_p1, channels)                      # conv1x3_1
    y = jnp.maximum(y * s1 + t1, 0.0)                                  # bn1 + relu
    y = _conv3(y, wh2, dilated * width, mh_nd, mh_pd, channels) + b3   # conv3x1_2 (dil)
    y = jnp.maximum(y, 0.0)                                            # relu
    y = _conv3(y, ww2, dilated, mw_nd, mw_pd, channels)                # conv1x3_2 (dil)
    y = y * s2 + t2                                                    # bn2
    o_ref[...] = jnp.maximum(y + x_ref[...], 0.0).astype(o_ref.dtype)  # residual + relu


def non_bottleneck_1d(x_nchw, params, dilated):
    """x_nchw: (B, C, H, W) float32. Returns (B, C, H, W)."""
    B, C, H, W = x_nchw.shape
    HW = H * W
    x2 = x_nchw.reshape(B, C, HW)      # free reshape, no data movement

    eps = 1e-3

    def fold_bn(p):
        scale = p["gamma"] / jnp.sqrt(p["var"] + eps)
        shift = p["beta"] - p["mean"] * scale
        return scale, shift

    def stack_taps(w3):
        # w3: (Cout, Cin, 3) per-tap -> (Cout, 3*Cin) = [center | tap0 | tap2]
        return jnp.concatenate([w3[:, :, 1], w3[:, :, 0], w3[:, :, 2]], axis=1)

    wh1 = stack_taps(params["conv3x1_1"]["w"][:, :, :, 0])
    ww1 = stack_taps(params["conv1x3_1"]["w"][:, :, 0, :])
    wh2 = stack_taps(params["conv3x1_2"]["w"][:, :, :, 0])
    ww2 = stack_taps(params["conv1x3_2"]["w"][:, :, 0, :])

    s1, t1 = fold_bn(params["bn1"])
    s2, t2 = fold_bn(params["bn2"])
    t1 = s1 * params["conv1x3_1"]["b"] + t1      # fold conv1x3 biases into BN shifts
    t2 = s2 * params["conv1x3_2"]["b"] + t2
    zeros = jnp.zeros((C,), jnp.float32)
    pv = jnp.stack([params["conv3x1_1"]["b"], params["conv3x1_2"]["b"],
                    s1, t1, s2, t2, zeros, zeros], axis=1).astype(jnp.float32)  # (C, 8)

    lin = jnp.arange(HW, dtype=jnp.int32)
    w_idx = (lin % W).reshape(1, HW)
    h_idx = (lin // W).reshape(1, HW)

    kernel = functools.partial(_nb1d_kernel, channels=C, height=H, width=W,
                               dilated=dilated)

    flops = 4 * 2 * 3 * B * C * C * HW + 12 * B * C * HW
    bytes_accessed = 2 * B * C * HW * 4 + 4 * C * 3 * C * 4 + (C * 8 + 2 * HW) * 4

    # VMEM budget: in/out double-buffered + live f32 temporaries (3C-row stacked
    # operand, conv result, shifted copies) + weights.  Raise above the 32 MiB
    # scoped default when needed (v5e/v6e: 128 MiB physical); cap at 100 MiB.
    work = (4 * C * HW * 4) + (8 * C * HW * 4) + (4 * C * 3 * C * 4) + (C * 8 + 2 * HW) * 4
    vmem_limit = int(max(32 * 1024 * 1024, min(100 * 1024 * 1024, 2 * work)))

    wspec = pl.BlockSpec((C, 3 * C), lambda b: (0, 0))
    xspec = pl.BlockSpec((pl.Squeezed(), C, HW), lambda b: (b, 0, 0))

    out = pl.pallas_call(
        kernel,
        out_shape=jax.ShapeDtypeStruct((B, C, HW), x_nchw.dtype),
        grid_spec=pltpu.PrefetchScalarGridSpec(
            num_scalar_prefetch=0,
            grid=(B,),
            in_specs=[
                pl.BlockSpec((1, HW), lambda b: (0, 0)),   # w coordinate per lane
                pl.BlockSpec((1, HW), lambda b: (0, 0)),   # h coordinate per lane
                xspec,                                     # x
                wspec, wspec, wspec, wspec,                # 4 stacked (C, 3C) conv weights
                pl.BlockSpec((C, 8), lambda b: (0, 0)),    # packed per-channel params
            ],
            out_specs=xspec,
        ),
        compiler_params=pltpu.CompilerParams(
            dimension_semantics=("parallel",),
            vmem_limit_bytes=vmem_limit,
        ),
        cost_estimate=pl.CostEstimate(
            flops=flops, transcendentals=0, bytes_accessed=bytes_accessed),
    )(w_idx, h_idx, x2, wh1, ww1, wh2, ww2, pv)

    return out.reshape(B, C, H, W)     # free reshape back to NCHW


def init_params(key, channels):
    """Deterministic params matching the PyTorch module's shapes (BN in eval mode)."""
    ks = jax.random.split(key, 16)
    s = 0.1

    def conv(i, kh, kw):
        return {"w": s * jax.random.normal(ks[i], (channels, channels, kh, kw), jnp.float32),
                "b": s * jax.random.normal(ks[i + 1], (channels,), jnp.float32)}

    def bn(i):
        return {"gamma": 1.0 + 0.1 * jax.random.normal(ks[i], (channels,), jnp.float32),
                "beta": 0.1 * jax.random.normal(ks[i + 1], (channels,), jnp.float32),
                "mean": 0.1 * jax.random.normal(ks[i + 2], (channels,), jnp.float32),
                "var": jax.random.uniform(ks[i + 3], (channels,), jnp.float32, 0.5, 1.5)}

    return {
        "conv3x1_1": conv(0, 3, 1),
        "conv1x3_1": conv(2, 1, 3),
        "conv3x1_2": conv(4, 3, 1),
        "conv1x3_2": conv(6, 1, 3),
        "bn1": bn(8),
        "bn2": bn(12),
    }


def reference(x, params, dilated):
    """Pure-JAX reference reproducing the PyTorch forward (BN in eval mode)."""
    eps = 1e-3
    dn = ("NCHW", "OIHW", "NCHW")

    def conv(x, p, pad, dil):
        y = lax.conv_general_dilated(
            x, p["w"], window_strides=(1, 1), padding=pad,
            rhs_dilation=dil, dimension_numbers=dn,
            precision=lax.Precision.HIGHEST)
        return y + p["b"][None, :, None, None]

    def bn(x, p):
        return ((x - p["mean"][None, :, None, None])
                / jnp.sqrt(p["var"][None, :, None, None] + eps)
                * p["gamma"][None, :, None, None]
                + p["beta"][None, :, None, None])

    y = conv(x, params["conv3x1_1"], ((1, 1), (0, 0)), (1, 1))
    y = jax.nn.relu(y)
    y = conv(y, params["conv1x3_1"], ((0, 0), (1, 1)), (1, 1))
    y = jax.nn.relu(bn(y, params["bn1"]))
    y = conv(y, params["conv3x1_2"], ((dilated, dilated), (0, 0)), (dilated, 1))
    y = jax.nn.relu(y)
    y = conv(y, params["conv1x3_2"], ((0, 0), (dilated, dilated)), (1, dilated))
    y = bn(y, params["bn2"])
    return jax.nn.relu(y + x)


if __name__ == "__main__":
    B, C, H, W = 2, 8, 16, 16
    dilated = 2
    key = jax.random.PRNGKey(0)
    kx, kp = jax.random.split(key)
    x = jax.random.normal(kx, (B, C, H, W), jnp.float32)
    params = init_params(kp, C)

    out = non_bottleneck_1d(x, params, dilated)
    out = jax.block_until_ready(out)

    ref = reference(x, params, dilated)
    assert out.shape == (B, C, H, W)
    err = float(jnp.max(jnp.abs(out - ref)))
    assert jnp.allclose(out, ref, atol=1e-4, rtol=1e-4), f"mismatch vs reference, max abs err {err:e}"
    print("KERNEL_OK")
</pallas_src>

<mosaic_0001>
module attributes {stable_mosaic.version = 11 : i64} {
  func.func @_nb1d_kernel(%arg0: i32, %arg1: memref<1x256xi32, #tpu.memory_space<vmem>>, %arg2: memref<1x256xi32, #tpu.memory_space<vmem>>, %arg3: memref<1x8x256xf32, #tpu.memory_space<vmem>>, %arg4: memref<8x24xf32, #tpu.memory_space<vmem>>, %arg5: memref<8x24xf32, #tpu.memory_space<vmem>>, %arg6: memref<8x24xf32, #tpu.memory_space<vmem>>, %arg7: memref<8x24xf32, #tpu.memory_space<vmem>>, %arg8: memref<8x8xf32, #tpu.memory_space<vmem>>, %arg9: memref<1x8x256xf32, #tpu.memory_space<vmem>>) attributes {dimension_semantics = [#tpu.dimension_semantics<parallel>], iteration_bounds = array<i64: 2>, scalar_prefetch = 0 : i64, scratch_operands = 0 : i64, tpu.core_type = #tpu.core_type<tc>, window_params = [{pipeline_mode = #tpu.pipeline_mode<synchronous>, transform_indices = @transform_0, window_bounds = array<i64: 1, 256>}, {pipeline_mode = #tpu.pipeline_mode<synchronous>, transform_indices = @transform_1, window_bounds = array<i64: 1, 256>}, {transform_indices = @transform_2, window_bounds = array<i64: 1, 8, 256>}, {pipeline_mode = #tpu.pipeline_mode<synchronous>, transform_indices = @transform_3, window_bounds = array<i64: 8, 24>}, {pipeline_mode = #tpu.pipeline_mode<synchronous>, transform_indices = @transform_4, window_bounds = array<i64: 8, 24>}, {pipeline_mode = #tpu.pipeline_mode<synchronous>, transform_indices = @transform_5, window_bounds = array<i64: 8, 24>}, {pipeline_mode = #tpu.pipeline_mode<synchronous>, transform_indices = @transform_6, window_bounds = array<i64: 8, 24>}, {pipeline_mode = #tpu.pipeline_mode<synchronous>, transform_indices = @transform_7, window_bounds = array<i64: 8, 8>}, {transform_indices = @transform_8, window_bounds = array<i64: 1, 8, 256>}]} {
    %c0 = arith.constant 0 : index
    %c0_0 = arith.constant 0 : index
    %c0_1 = arith.constant 0 : index
    %0 = vector.load %arg3[%c0, %c0_0, %c0_1] : memref<1x8x256xf32, #tpu.memory_space<vmem>>, vector<1x8x256xf32>
    %1 = vector.shape_cast %0 : vector<1x8x256xf32> to vector<8x256xf32>
    %c0_2 = arith.constant 0 : index
    %c0_3 = arith.constant 0 : index
    %2 = vector.load %arg1[%c0_2, %c0_3] : memref<1x256xi32, #tpu.memory_space<vmem>>, vector<1x256xi32>
    %c0_4 = arith.constant 0 : index
    %c0_5 = arith.constant 0 : index
    %3 = vector.load %arg2[%c0_4, %c0_5] : memref<1x256xi32, #tpu.memory_space<vmem>>, vector<1x256xi32>
    %c1_i32 = arith.constant 1 : i32
    %4 = vector.broadcast %c1_i32 : i32 to vector<1x256xi32>
    %5 = arith.cmpi sge, %3, %4 : vector<1x256xi32>
    %c15_i32 = arith.constant 15 : i32
    %6 = vector.broadcast %c15_i32 : i32 to vector<1x256xi32>
    %7 = arith.cmpi slt, %3, %6 : vector<1x256xi32>
    %c1_i32_6 = arith.constant 1 : i32
    %8 = vector.broadcast %c1_i32_6 : i32 to vector<1x256xi32>
    %9 = arith.cmpi sge, %2, %8 : vector<1x256xi32>
    %c15_i32_7 = arith.constant 15 : i32
    %10 = vector.broadcast %c15_i32_7 : i32 to vector<1x256xi32>
    %11 = arith.cmpi slt, %2, %10 : vector<1x256xi32>
    %c2_i32 = arith.constant 2 : i32
    %12 = vector.broadcast %c2_i32 : i32 to vector<1x256xi32>
    %13 = arith.cmpi sge, %3, %12 : vector<1x256xi32>
    %c14_i32 = arith.constant 14 : i32
    %14 = vector.broadcast %c14_i32 : i32 to vector<1x256xi32>
    %15 = arith.cmpi slt, %3, %14 : vector<1x256xi32>
    %c2_i32_8 = arith.constant 2 : i32
    %16 = vector.broadcast %c2_i32_8 : i32 to vector<1x256xi32>
    %17 = arith.cmpi sge, %2, %16 : vector<1x256xi32>
    %c14_i32_9 = arith.constant 14 : i32
    %18 = vector.broadcast %c14_i32_9 : i32 to vector<1x256xi32>
    %19 = arith.cmpi slt, %2, %18 : vector<1x256xi32>
    %c0_10 = arith.constant 0 : index
    %c0_11 = arith.constant 0 : index
    %20 = vector.load %arg8[%c0_10, %c0_11] : memref<8x8xf32, #tpu.memory_space<vmem>>, vector<8x8xf32>
    %21 = vector.extract_strided_slice %20 {offsets = [0, 0], sizes = [8, 1], strides = [1, 1]} : vector<8x8xf32> to vector<8x1xf32>
    %22 = vector.extract_strided_slice %20 {offsets = [0, 1], sizes = [8, 1], strides = [1, 1]} : vector<8x8xf32> to vector<8x1xf32>
    %23 = vector.extract_strided_slice %20 {offsets = [0, 2], sizes = [8, 1], strides = [1, 1]} : vector<8x8xf32> to vector<8x1xf32>
    %24 = vector.extract_strided_slice %20 {offsets = [0, 3], sizes = [8, 1], strides = [1, 1]} : vector<8x8xf32> to vector<8x1xf32>
    %25 = vector.extract_strided_slice %20 {offsets = [0, 4], sizes = [8, 1], strides = [1, 1]} : vector<8x8xf32> to vector<8x1xf32>
    %26 = vector.extract_strided_slice %20 {offsets = [0, 5], sizes = [8, 1], strides = [1, 1]} : vector<8x8xf32> to vector<8x1xf32>
    %c0_12 = arith.constant 0 : index
    %c0_13 = arith.constant 0 : index
    %27 = vector.load %arg4[%c0_12, %c0_13] : memref<8x24xf32, #tpu.memory_space<vmem>>, vector<8x24xf32>
    %c0_14 = arith.constant 0 : index
    %c0_15 = arith.constant 0 : index
    %28 = vector.load %arg5[%c0_14, %c0_15] : memref<8x24xf32, #tpu.memory_space<vmem>>, vector<8x24xf32>
    %c0_16 = arith.constant 0 : index
    %c0_17 = arith.constant 0 : index
    %29 = vector.load %arg6[%c0_16, %c0_17] : memref<8x24xf32, #tpu.memory_space<vmem>>, vector<8x24xf32>
    %c0_18 = arith.constant 0 : index
    %c0_19 = arith.constant 0 : index
    %30 = vector.load %arg7[%c0_18, %c0_19] : memref<8x24xf32, #tpu.memory_space<vmem>>, vector<8x24xf32>
    %c16_i32 = arith.constant 16 : i32
    %31 = tpu.dynamic_rotate %1 by %c16_i32 dim 1 : vector<8x256xf32>, i32 -> vector<8x256xf32>
    %cst = arith.constant 0.000000e+00 : f32
    %32 = vector.shape_cast %5 : vector<1x256xi1> to vector<1x256xi1>
    %33 = vector.broadcast %32 : vector<1x256xi1> to vector<8x256xi1>
    %34 = vector.broadcast %cst : f32 to vector<8x256xf32>
    %35 = arith.select %33, %31, %34 : vector<8x256xi1>, vector<8x256xf32>
    %c240_i32 = arith.constant 240 : i32
    %36 = tpu.dynamic_rotate %1 by %c240_i32 dim 1 : vector<8x256xf32>, i32 -> vector<8x256xf32>
    %cst_20 = arith.constant 0.000000e+00 : f32
    %37 = vector.shape_cast %7 : vector<1x256xi1> to vector<1x256xi1>
    %38 = vector.broadcast %37 : vector<1x256xi1> to vector<8x256xi1>
    %39 = vector.broadcast %cst_20 : f32 to vector<8x256xf32>
    %40 = arith.select %38, %36, %39 : vector<8x256xi1>, vector<8x256xf32>
    %41 = tpu.concatenate %1, %35, %40 in 0 : vector<8x256xf32>, vector<8x256xf32>, vector<8x256xf32> -> vector<24x256xf32>
    %cst_21 = arith.constant dense<0.000000e+00> : vector<8x256xf32>
    %42 = tpu.matmul %27, %41, %cst_21 {dimension_numbers = #tpu.dot_dimension_numbers<[1], [0], [0], [1], [0, 0, 1, 1], [], []>} : vector<8x24xf32>, vector<24x256xf32>, vector<8x256xf32> -> vector<8x256xf32>
    %43 = vector.broadcast %21 : vector<8x1xf32> to vector<8x256xf32>
    %44 = arith.addf %42, %43 : vector<8x256xf32>
    %cst_22 = arith.constant 0.000000e+00 : f32
    %45 = vector.broadcast %cst_22 : f32 to vector<8x256xf32>
    %46 = arith.maximumf %44, %45 : vector<8x256xf32>
    %c1_i32_23 = arith.constant 1 : i32
    %47 = tpu.dynamic_rotate %46 by %c1_i32_23 dim 1 : vector<8x256xf32>, i32 -> vector<8x256xf32>
    %cst_24 = arith.constant 0.000000e+00 : f32
    %48 = vector.shape_cast %9 : vector<1x256xi1> to vector<1x256xi1>
    %49 = vector.broadcast %48 : vector<1x256xi1> to vector<8x256xi1>
    %50 = vector.broadcast %cst_24 : f32 to vector<8x256xf32>
    %51 = arith.select %49, %47, %50 : vector<8x256xi1>, vector<8x256xf32>
    %c255_i32 = arith.constant 255 : i32
    %52 = tpu.dynamic_rotate %46 by %c255_i32 dim 1 : vector<8x256xf32>, i32 -> vector<8x256xf32>
    %cst_25 = arith.constant 0.000000e+00 : f32
    %53 = vector.shape_cast %11 : vector<1x256xi1> to vector<1x256xi1>
    %54 = vector.broadcast %53 : vector<1x256xi1> to vector<8x256xi1>
    %55 = vector.broadcast %cst_25 : f32 to vector<8x256xf32>
    %56 = arith.select %54, %52, %55 : vector<8x256xi1>, vector<8x256xf32>
    %57 = tpu.concatenate %46, %51, %56 in 0 : vector<8x256xf32>, vector<8x256xf32>, vector<8x256xf32> -> vector<24x256xf32>
    %cst_26 = arith.constant dense<0.000000e+00> : vector<8x256xf32>
    %58 = tpu.matmul %28, %57, %cst_26 {dimension_numbers = #tpu.dot_dimension_numbers<[1], [0], [0], [1], [0, 0, 1, 1], [], []>} : vector<8x24xf32>, vector<24x256xf32>, vector<8x256xf32> -> vector<8x256xf32>
    %59 = vector.broadcast %23 : vector<8x1xf32> to vector<8x256xf32>
    %60 = arith.mulf %58, %59 : vector<8x256xf32>
    %61 = vector.broadcast %24 : vector<8x1xf32> to vector<8x256xf32>
    %62 = arith.addf %60, %61 : vector<8x256xf32>
    %cst_27 = arith.constant 0.000000e+00 : f32
    %63 = vector.broadcast %cst_27 : f32 to vector<8x256xf32>
    %64 = arith.maximumf %62, %63 : vector<8x256xf32>
    %c32_i32 = arith.constant 32 : i32
    %65 = tpu.dynamic_rotate %64 by %c32_i32 dim 1 : vector<8x256xf32>, i32 -> vector<8x256xf32>
    %cst_28 = arith.constant 0.000000e+00 : f32
    %66 = vector.shape_cast %13 : vector<1x256xi1> to vector<1x256xi1>
    %67 = vector.broadcast %66 : vector<1x256xi1> to vector<8x256xi1>
    %68 = vector.broadcast %cst_28 : f32 to vector<8x256xf32>
    %69 = arith.select %67, %65, %68 : vector<8x256xi1>, vector<8x256xf32>
    %c224_i32 = arith.constant 224 : i32
    %70 = tpu.dynamic_rotate %64 by %c224_i32 dim 1 : vector<8x256xf32>, i32 -> vector<8x256xf32>
    %cst_29 = arith.constant 0.000000e+00 : f32
    %71 = vector.shape_cast %15 : vector<1x256xi1> to vector<1x256xi1>
    %72 = vector.broadcast %71 : vector<1x256xi1> to vector<8x256xi1>
    %73 = vector.broadcast %cst_29 : f32 to vector<8x256xf32>
    %74 = arith.select %72, %70, %73 : vector<8x256xi1>, vector<8x256xf32>
    %75 = tpu.concatenate %64, %69, %74 in 0 : vector<8x256xf32>, vector<8x256xf32>, vector<8x256xf32> -> vector<24x256xf32>
    %cst_30 = arith.constant dense<0.000000e+00> : vector<8x256xf32>
    %76 = tpu.matmul %29, %75, %cst_30 {dimension_numbers = #tpu.dot_dimension_numbers<[1], [0], [0], [1], [0, 0, 1, 1], [], []>} : vector<8x24xf32>, vector<24x256xf32>, vector<8x256xf32> -> vector<8x256xf32>
    %77 = vector.broadcast %22 : vector<8x1xf32> to vector<8x256xf32>
    %78 = arith.addf %76, %77 : vector<8x256xf32>
    %cst_31 = arith.constant 0.000000e+00 : f32
    %79 = vector.broadcast %cst_31 : f32 to vector<8x256xf32>
    %80 = arith.maximumf %78, %79 : vector<8x256xf32>
    %c2_i32_32 = arith.constant 2 : i32
    %81 = tpu.dynamic_rotate %80 by %c2_i32_32 dim 1 : vector<8x256xf32>, i32 -> vector<8x256xf32>
    %cst_33 = arith.constant 0.000000e+00 : f32
    %82 = vector.shape_cast %17 : vector<1x256xi1> to vector<1x256xi1>
    %83 = vector.broadcast %82 : vector<1x256xi1> to vector<8x256xi1>
    %84 = vector.broadcast %cst_33 : f32 to vector<8x256xf32>
    %85 = arith.select %83, %81, %84 : vector<8x256xi1>, vector<8x256xf32>
    %c254_i32 = arith.constant 254 : i32
    %86 = tpu.dynamic_rotate %80 by %c254_i32 dim 1 : vector<8x256xf32>, i32 -> vector<8x256xf32>
    %cst_34 = arith.constant 0.000000e+00 : f32
    %87 = vector.shape_cast %19 : vector<1x256xi1> to vector<1x256xi1>
    %88 = vector.broadcast %87 : vector<1x256xi1> to vector<8x256xi1>
    %89 = vector.broadcast %cst_34 : f32 to vector<8x256xf32>
    %90 = arith.select %88, %86, %89 : vector<8x256xi1>, vector<8x256xf32>
    %91 = tpu.concatenate %80, %85, %90 in 0 : vector<8x256xf32>, vector<8x256xf32>, vector<8x256xf32> -> vector<24x256xf32>
    %cst_35 = arith.constant dense<0.000000e+00> : vector<8x256xf32>
    %92 = tpu.matmul %30, %91, %cst_35 {dimension_numbers = #tpu.dot_dimension_numbers<[1], [0], [0], [1], [0, 0, 1, 1], [], []>} : vector<8x24xf32>, vector<24x256xf32>, vector<8x256xf32> -> vector<8x256xf32>
    %93 = vector.broadcast %25 : vector<8x1xf32> to vector<8x256xf32>
    %94 = arith.mulf %92, %93 : vector<8x256xf32>
    %95 = vector.broadcast %26 : vector<8x1xf32> to vector<8x256xf32>
    %96 = arith.addf %94, %95 : vector<8x256xf32>
    %c0_36 = arith.constant 0 : index
    %c0_37 = arith.constant 0 : index
    %c0_38 = arith.constant 0 : index
    %97 = vector.load %arg3[%c0_36, %c0_37, %c0_38] : memref<1x8x256xf32, #tpu.memory_space<vmem>>, vector<1x8x256xf32>
    %98 = vector.shape_cast %97 : vector<1x8x256xf32> to vector<8x256xf32>
    %99 = arith.addf %96, %98 : vector<8x256xf32>
    %cst_39 = arith.constant 0.000000e+00 : f32
    %100 = vector.broadcast %cst_39 : f32 to vector<8x256xf32>
    %101 = arith.maximumf %99, %100 : vector<8x256xf32>
    %c0_40 = arith.constant 0 : index
    %c0_41 = arith.constant 0 : index
    %c0_42 = arith.constant 0 : index
    %102 = vector.load %arg9[%c0_40, %c0_41, %c0_42] : memref<1x8x256xf32, #tpu.memory_space<vmem>>, vector<1x8x256xf32>
    %103 = vector.shape_cast %102 : vector<1x8x256xf32> to vector<8x256xf32>
    %104 = vector.shape_cast %101 : vector<8x256xf32> to vector<1x8x256xf32>
    tpu.vector_store %arg9[%c0_40, %c0_41, %c0_42], %104 {strides = array<i32>} : memref<1x8x256xf32, #tpu.memory_space<vmem>>, vector<1x8x256xf32>,
    return
  }
  func.func @transform_0(%arg0: i32) -> (i32, i32) {
    %c0_i32 = arith.constant 0 : i32
    %c0_i32_0 = arith.constant 0 : i32
    %c0_i32_1 = arith.constant 0 : i32
    return %c0_i32, %c0_i32_0 : i32, i32
  }
  func.func @transform_1(%arg0: i32) -> (i32, i32) {
    %c0_i32 = arith.constant 0 : i32
    %c0_i32_0 = arith.constant 0 : i32
    %c0_i32_1 = arith.constant 0 : i32
    return %c0_i32, %c0_i32_0 : i32, i32
  }
  func.func @transform_2(%arg0: i32) -> (i32, i32, i32) {
    %c0_i32 = arith.constant 0 : i32
    %c0_i32_0 = arith.constant 0 : i32
    %c0_i32_1 = arith.constant 0 : i32
    return %arg0, %c0_i32, %c0_i32_0 : i32, i32, i32
  }
  func.func @transform_3(%arg0: i32) -> (i32, i32) {
    %c0_i32 = arith.constant 0 : i32
    %c0_i32_0 = arith.constant 0 : i32
    %c0_i32_1 = arith.constant 0 : i32
    return %c0_i32, %c0_i32_0 : i32, i32
  }
  func.func @transform_4(%arg0: i32) -> (i32, i32) {
    %c0_i32 = arith.constant 0 : i32
    %c0_i32_0 = arith.constant 0 : i32
    %c0_i32_1 = arith.constant 0 : i32
    return %c0_i32, %c0_i32_0 : i32, i32
  }
  func.func @transform_5(%arg0: i32) -> (i32, i32) {
    %c0_i32 = arith.constant 0 : i32
    %c0_i32_0 = arith.constant 0 : i32
    %c0_i32_1 = arith.constant 0 : i32
    return %c0_i32, %c0_i32_0 : i32, i32
  }
  func.func @transform_6(%arg0: i32) -> (i32, i32) {
    %c0_i32 = arith.constant 0 : i32
    %c0_i32_0 = arith.constant 0 : i32
    %c0_i32_1 = arith.constant 0 : i32
    return %c0_i32, %c0_i32_0 : i32, i32
  }
  func.func @transform_7(%arg0: i32) -> (i32, i32) {
    %c0_i32 = arith.constant 0 : i32
    %c0_i32_0 = arith.constant 0 : i32
    %c0_i32_1 = arith.constant 0 : i32
    return %c0_i32, %c0_i32_0 : i32, i32
  }
  func.func @transform_8(%arg0: i32) -> (i32, i32, i32) {
    %c0_i32 = arith.constant 0 : i32
    %c0_i32_0 = arith.constant 0 : i32
    %c0_i32_1 = arith.constant 0 : i32
    return %arg0, %c0_i32, %c0_i32_0 : i32, i32, i32
  }
}

</mosaic_0001>

<bundles_post_ra>
// kernel: tpu_custom_call.1
= control target key start
LH: loop header
LB: loop body
LE: loop exit
PB: predicated region body
PF: predicated region fallthrough
CT: control target
= control target key end

     0   :  { %13 = vsyncpa [#allocation3], 0  ;;  %s1801_s0 = inlined_call_operand.hbm [shape: s32[1,256], index: 0, kind: input, shape index: {}]   ;;  %s1802_s1 = inlined_call_operand.vmem [shape: s32[1,256], index: 1, kind: input, shape index: {}]   ;;  %s1803_s2 = inlined_call_operand.hbm [shape: f32[2,8,256], index: 2, kind: input, shape index: {}]   ;;  %s1804_s3 = inlined_call_operand.vmem [shape: f32[8,24], index: 3, kind: input, shape index: {}]   ;;  %s1805_s4 = inlined_call_operand.hbm [shape: f32[8,24], index: 4, kind: input, shape index: {}]   ;;  %s1806_s5 = inlined_call_operand.vmem [shape: f32[8,24], index: 5, kind: input, shape index: {}]   ;;  %s1807_s6 = inlined_call_operand.hbm [shape: f32[8,24], index: 6, kind: input, shape index: {}]   ;;  %s1808_s7 = inlined_call_operand.vmem [shape: f32[8,8], index: 7, kind: input, shape index: {}]   ;;  %s1809_s8 = inlined_call_operand.hbm [shape: f32[2,8,256], index: 8, kind: output, shape index: {}]  }
   0x1   :  { %14 = vsyncpa [#allocation6], 0 }
   0x2   :  { %16 = vsyncpa [#allocation6 + $0x1], 0 }
   0x3   :  { %17 = vsyncpa [#allocation9], 0 }
   0x4   :  { %18 = vsyncpa [#allocation4], 0 }
   0x5   :  { %20 = vsyncpa [#allocation4 + $0x1], 0  ;;  %s1442_s27 = smov 0   ;;  %s1444_s28 = smov 0  }
   0x6   :  { %s1446_s29 = smov 0   ;;  %s1448_s30 = smov 0  }
   0x7 LB: > { %s1463_s9 = sadd.s32 4294967295, %s1374_s30   ;;  %s997_s10 = sadd.s32 4294967294, %s1374_s30   ;;  %s1374_s30 = sphi %s1448_s30, %s1834_s30   ;;  %s1370_s29 = sphi %s1446_s29, %s1833_s29   ;;  %s1366_s28 = sphi %s1444_s28, %s1832_s28   ;;  %s1362_s27 = sphi %s1442_s27, %s1831_s27  }
   0x8   : > { %p88_p0 = scmp.ne.s32.totalorder %s1366_s28, %s1362_s27  ;;  %p1810_p1 = scmp.eq.s32.totalorder %s1463_s9, 0 }
   0x9   : > { %p223_p3 = scmp.eq.s32.totalorder %s997_s10, 1  ;;  %p998_p5 = scmp.ge.s32.totalorder %s1374_s30, 1 }
   0xa   : > { %p1472_p4 = por %p1810_p1, %p88_p0  ;;  %p230_p7 = scmp.lt.s32.totalorder %s1374_s30, 3 }
   0xb   : > { %p1477_p6 = por %p223_p3, %p88_p0  ;;  %s1376_s14 = smov [#allocation7]  }
   0xc   : > { %s1813_s11 = scalar_select %p1472_p4, 1, 0 }
   0xd   : > { %s1814_s12 = scalar_select %p1477_p6, 1, 0 }
   0xe   : > { %p1482_p8 = pnand %p998_p5, %p230_p7  ;;  %s260_s15 = sshll.u32 %s1376_s14, 4  ;;  %s261_s15 = int_to_ptr.vmem [resolvable:$true] %s260_s15 }
   0xf   : > { %s1377_s16 = smov [#allocation2]   ;;  %s1378_s19 = smov [#allocation8]  }
  0x10   : > { %s1815_s13 = scalar_select %p1482_p8, 1, 0 }
  0x11   : > { %p1079_p10 = pneg %p1482_p8  ;;  %s243_s17 = sshll.u32 %s1377_s16, 4  ;;  %s1495_s17 = int_to_ptr.vmem [resolvable:$true] %s243_s17 }
  0x12   : > { %s274_s20 = sshll.u32 %s1378_s19, 4  ;;  %s1182_s23 = scalar_lea.hbm %s1805_s4, 128  ;;  %s1497_s20 = int_to_ptr.vmem [resolvable:$true] %s274_s20 }
  0x13   : > { %p1491_p11 = pnand %p1079_p10, %p1810_p1  ;;  %p1183_p12 = scmp.ne.s32.totalorder %s1805_s4, %s1182_s23 }
  0x14   : > { %p1189_p5 = scmp.lt.u32.totalorder %s1182_s23, %s1805_s4 }
  0x15   : > { %p1507_p13 = pneg %p1491_p11 }
  0x17   : > { %p1185_p0 = pnand %p1507_p13, %p1183_p12 }
  0x19   : > { %p1186_p3 = pneg %p1185_p0 }
  0x1b   : > { %p1191_p7 = pnand %p1189_p5, %p1186_p3 }
  0x1d   : > { %1194 = shalt.err (!%p1191_p7)
}
  0x1e   : > { %s1195_s16 = scalar_lea.vmem %s261_s15, 128  ;;  %p1203_p2 = scmp.lt.s32.totalorder %s261_s15, %s261_s15 }
  0x1f   : > { %p1196_p10 = scmp.ne.s32.totalorder %s261_s15, %s1195_s16  ;;  %p1204_p6 = scmp.lt.s32.totalorder %s1195_s16, %s1195_s16 }
  0x21   : > { %p1198_p9 = pnand %p1196_p10, %p1507_p13  ;;  %p1205_p4 = por %p1204_p6, %p1203_p2 }
  0x23   : > { %p1199_p1 = pneg %p1198_p9 }
  0x25   : > { %p1206_p8 = pnand %p1205_p4, %p1199_p1 }
  0x27   : > { %1209 = shalt.err (!%p1206_p8)
}
  0x28   : > { %1085 = dma.hbm_to_vmem [thread:$0]  (!%p1491_p11), %s1805_s4, 128, %s261_s15, [#allocation6]  }
  0x29   : > { %s1210_s24 = scalar_lea.hbm %s1801_s0, 32 }
  0x2a   : > { %p1211_p9 = scmp.ne.s32.totalorder %s1801_s0, %s1210_s24  ;;  %p1217_p1 = scmp.lt.u32.totalorder %s1210_s24, %s1801_s0 }
  0x2c   : > { %p1213_p12 = pnand %p1211_p9, %p1507_p13 }
  0x2e   : > { %p1214_p2 = pneg %p1213_p12 }
  0x30   : > { %p1219_p4 = pnand %p1217_p1, %p1214_p2 }
  0x32   : > { %1222 = shalt.err (!%p1219_p4)
}
  0x33   : > { %s1223_s15 = scalar_lea.vmem %s1495_s17, 32  ;;  %p1231_p3 = scmp.lt.s32.totalorder %s1495_s17, %s1495_s17 }
  0x34   : > { %p1224_p6 = scmp.ne.s32.totalorder %s1495_s17, %s1223_s15  ;;  %p1232_p5 = scmp.lt.s32.totalorder %s1223_s15, %s1223_s15 }
  0x36   : > { %p1226_p8 = pnand %p1224_p6, %p1507_p13  ;;  %p1233_p7 = por %p1232_p5, %p1231_p3 }
  0x38   : > { %p1227_p0 = pneg %p1226_p8 }
  0x3a   : > { %p1234_p10 = pnand %p1233_p7, %p1227_p0 }
  0x3c   : > { %1237 = shalt.err (!%p1234_p10)
}
  0x3d   : > { %1082 = dma.hbm_to_vmem [thread:$0]  (!%p1491_p11), %s1801_s0, 32, %s1495_s17, [#allocation3]  }
  0x3e   : > { %s1238_s24 = scalar_lea.hbm %s1807_s6, 128 }
  0x3f   : > { %p1239_p9 = scmp.ne.s32.totalorder %s1807_s6, %s1238_s24  ;;  %p1245_p1 = scmp.lt.u32.totalorder %s1238_s24, %s1807_s6 }
  0x41   : > { %p1241_p12 = pnand %p1239_p9, %p1507_p13 }
  0x43   : > { %p1242_p2 = pneg %p1241_p12 }
  0x45   : > { %p1247_p4 = pnand %p1245_p1, %p1242_p2 }
  0x47   : > { %1250 = shalt.err (!%p1247_p4)
}
  0x48   : > { %s1251_s17 = scalar_lea.vmem %s1497_s20, 128  ;;  %p1259_p3 = scmp.lt.s32.totalorder %s1497_s20, %s1497_s20 }
  0x49   : > { %p1252_p6 = scmp.ne.s32.totalorder %s1497_s20, %s1251_s17  ;;  %p1260_p5 = scmp.lt.s32.totalorder %s1251_s17, %s1251_s17 }
  0x4b   : > { %p1254_p8 = pnand %p1252_p6, %p1507_p13  ;;  %p1261_p7 = por %p1260_p5, %p1259_p3 }
  0x4d   : > { %p1255_p0 = pneg %p1254_p8 }
  0x4f   : > { %p1262_p10 = pnand %p1261_p7, %p1255_p0 }
  0x51   : > { %1265 = shalt.err (!%p1262_p10)
}
  0x52   : > { %1088 = dma.hbm_to_vmem [thread:$0]  (!%p1491_p11), %s1807_s6, 128, %s1497_s20, [#allocation9]  }
  0x53   : > { %s1570_s26 = sadd.s32 1, %s1374_s30   ;;  %s75_s21 = sadd.s32 1, %s1370_s29 }
  0x54   : > { %s72_s18 = ssub.s32 %s1374_s30, %s1570_s26  ;;  %p82_p9 = scmp.ne.s32.totalorder %s1370_s29, %s1366_s28 }
  0x55   : > { %p73_p13 = scmp.eq.s32.totalorder %s72_s18, 0  ;;  %p83_p12 = scmp.eq.s32.totalorder %s1374_s30, 0 }
  0x56   : > { %p1100_p2 = scmp.lt.s32.totalorder %s1374_s30, 2  ;;  %p1818_p4 = scmp.eq.s32.totalorder %s1463_s9, 1 }
  0x57   : > { %s1580_s22 = scalar_select %p73_p13, %s1370_s29, %s75_s21  }
  0x58   : > { %p84_p1 = por %p83_p12, %p82_p9  ;;  %p1584_p6 = por %p1818_p4, %p82_p9 }
  0x59   : > { %s288_s24 = sand.u32 1, %s1374_s30   ;;  %s290_s25 = sand.u32 1, %s1370_s29  }
  0x5a   : > { %s1003_s20 = sshll.u32 %s290_s25, 4  ;;  %s1037_s10 = sshll.u32 %s1374_s30, 8 }
  0x5b   : > { %s1594_s17 = scalar_lea.hbm %s1803_s2, %s1037_s10  ;;  %s292_s15 = scalar_lea.vmem [#allocation5], %s1003_s20 }
  0x5c   : > { %s300_s19 = sshll.u32 %s292_s15, 4  ;;  %p1598_p11 = pnand %p1100_p2, %p84_p1  ;;  %s1596_s19 = int_to_ptr.vmem [resolvable:$true] %s300_s19 }
  0x5d   : > { %s289_s21 = scalar_lea.sflag [#allocation6], %s288_s24  ;;  %s1266_s25 = scalar_lea.hbm %s1594_s17, 256 }
  0x5e   : > { %p1267_p8 = scmp.ne.s32.totalorder %s1594_s17, %s1266_s25  ;;  %p1268_p0 = pneg %p1598_p11 }
  0x5f   : > { %s1271_s14 = scalar_lea.hbm %s1803_s2, 512  ;;  %p1272_p7 = scmp.lt.u32.totalorder %s1594_s17, %s1803_s2 }
  0x60   : > { %p1269_p3 = pnand %p1268_p0, %p1267_p8  ;;  %p1273_p10 = scmp.lt.u32.totalorder %s1271_s14, %s1266_s25 }
  0x61   : > { %p1275_p9 = scmp.lt.u32.totalorder %s1266_s25, %s1594_s17 }
  0x62   : > { %p1270_p5 = pneg %p1269_p3  ;;  %p1274_p13 = por %p1273_p10, %p1272_p7 }
  0x64   : > { %p1276_p12 = por %p1275_p9, %p1274_p13 }
  0x66   : > { %p1277_p2 = pnand %p1276_p12, %p1270_p5 }
  0x68   : > { %1280 = shalt.err (!%p1277_p2)
}
  0x69   : > { %s1281_s24 = scalar_lea.vmem %s1596_s19, 256  ;;  %s1379_s10 = smov [#allocation5]  }
  0x6a   : > { %p1282_p1 = scmp.ne.s32.totalorder %s1596_s19, %s1281_s24  ;;  %s1286_s20 = sshll.u32 %s1379_s10, 4  ;;  %s1287_s20 = int_to_ptr.vmem [resolvable:$false] %s1286_s20 }
  0x6b   : > { %s1288_s16 = scalar_lea.vmem %s1287_s20, 512  ;;  %p1289_p3 = scmp.lt.s32.totalorder %s1596_s19, %s1287_s20 }
  0x6c   : > { %p1284_p4 = pnand %p1282_p1, %p1268_p0  ;;  %p1290_p7 = scmp.lt.s32.totalorder %s1288_s16, %s1281_s24 }
  0x6e   : > { %p1285_p8 = pneg %p1284_p4  ;;  %p1291_p10 = por %p1290_p7, %p1289_p3 }
  0x70   : > { %p1292_p13 = pnand %p1291_p10, %p1285_p8 }
  0x72   : > { %1295 = shalt.err (!%p1292_p13)
}
  0x73   : > { %1092 = dma.hbm_to_vmem [thread:$0]  (!%p1598_p11), %s1594_s17, 256, %s1596_s19, %s289_s21  }
  0x74   : > { %p1821_p5 = scmp.ne.s32.totalorder %s1815_s13, 0 }
  0x75   : > { %p1822_p0 = scmp.eq.s32.totalorder (!%p1821_p5), %s1463_s9, 0 }
  0x76   : > { %309 = sbr.rel (%p1821_p5) target bundleno = 1538 (0x602), region = 52 }
  0x7d   : > { %1341 = dma.done.wait (%p1822_p0), [#allocation3], 32   ;;  %p1823_p9 = pmov %p1822_p0 }
  0x7e   : > { %s315_s25 = sand.u32 1, %s1463_s9   ;;  %s317_s14 = sand.u32 1, %s1366_s28  }
  0x7f   : > { %1343 = vsyncadd (%p1823_p9), [#allocation3], 4294967264  ;;  %s1637_s18 = sshll.u32 %s317_s14, 4  ;;  %s316_s17 = scalar_lea.sflag [#allocation6], %s315_s25 }
  0x80   : > { %s319_s19 = scalar_lea.vmem [#allocation5], %s1637_s18  ;;  %p1824_p11 = scmp.ne.s32.totalorder %s1813_s11, 0 }
  0x82   : > { %1345 = dma.done.wait (%p1824_p11), %s316_s17, 256  }
  0x83   : > { %1347 = vsyncadd (%p1824_p11), %s316_s17, 4294967040  ;;  %p1825_p12 = pmov %p1822_p0 }
  0x84   : > { %p1826_p2 = pmov %p1822_p0 }
  0x85   : > { %1349 = dma.done.wait (%p1825_p12), [#allocation6], 128  }
  0x86   : > { %1351 = vsyncadd (%p1826_p2), [#allocation6], 4294967168  ;;  %p1827_p1 = pmov %p1822_p0 }
  0x87   : > { %p1828_p4 = pmov %p1822_p0 }
  0x88   : > { %1353 = dma.done.wait (%p1827_p1), [#allocation9], 128  }
  0x89   : > { %1355 = vsyncadd (%p1828_p4), [#allocation9], 4294967168  ;;  %v1380_v0 = vmov 0   ;;  %v1653_v1 = vld [vmem:[%s319_s19] sm:$0xff]  ;;  %v1655_v2 = vld [vmem:[%s319_s19 + $0x8] sm:$0xff]  ;;  %v1381_v3 = vmov 0.0   ;;  %v381_v6 = vlaneseq }
  0x8a   : > { %1161 = vset.pattern.permute.xlu1 %v1380_v0  ;;  %492 = vmatprep.mubr.f32.mxu0 %v1381_v3  ;;  %v1156_v4 = vpack.i.bf16 %v1655_v2, %v1653_v1  ;;  %s1382_s11 = smov 112   ;;  %v1665_v5 = vld [vmem:[%s1808_s7] sm:$0xff]  ;;  %s1383_s15 = smov 16   ;;  %vm1384_vm6 = vmmov 1   ;;  %vm424_vm11 = vcmask 195584   ;;  %v1386_v38 = vmov 2  }
  0x8b   : > { %608 = vmatprep.mubr.f32.mxu1 %v1381_v3  ;;  %401 = vrot.lane.b32.xlu1 %v1655_v2, %s1382_s11  ;;  %v1672_v7 = vld [vmem:[%s1802_s1] sm:$0x3]  ;;  %v388_v8 = vshrl.u32 %v381_v6, 7  ;;  %v1681_v12 = vand.u32 127, %v381_v6  ;;  %s1385_s25 = smov 127   ;;  %v1387_v39 = vmov 3  }
  0x8c   : > { %1157 = vrot.lane.b32.xlu0 %v1156_v4, %s1383_s15  ;;  %vm364_vm0 = vcmp.ge.s32.totalorder %v1672_v7, 1  ;;  %vm365_vm1 = vcmp.lt.s32.totalorder %v1672_v7, 15  ;;  %v373_v29 = vld [vmem:[%s1804_s3] sm:$0xff]  ;;  %s1388_s17 = smov 1   ;;  %v1701_v40 = vld [vmem:[#allocation2] sm:$0x3] }
  0x8d   : > { %v1675_v9 = vsub.s32 1, %v388_v8  ;;  %v386_v10 = vsel %vm364_vm0, 1, %v1380_v0  ;;  %v1678_v11 = vsub.s32 0, %v388_v8  ;;  %v406_v15 = vsel %vm365_vm1, 1, %v1380_v0  ;;  %1168 = vset.pattern.permute.xlu0 %v1387_v39  ;;  %v374_v57 = vld [vmem:[#allocation7] sm:$0xff]  ;;  %s1389_s19 = smov 96  }
  0x8e   : > { %vm383_vm2 = vcmp.lt.s32.totalorder %v1681_v12, 16  ;;  %vm403_vm5 = vcmp.lt.s32.totalorder %v1681_v12, 112  ;;  %vm366_vm12 = vcmp.ge.s32.totalorder %v1701_v40, 1  ;;  %vm367_vm13 = vcmp.lt.s32.totalorder %v1701_v40, 15  ;;  %s1392_s15 = smov 126   ;;  %s1395_s24 = smov 2  }
  0x8f   : > { %421 = vperm.xlu1 %1161, %v1665_v5   ;;  %v394_v13 = vrot.slane %v386_v10, %v1675_v9  ;;  %v390_v14 = vrot.slane %v386_v10, %v1678_v11  ;;  %v414_v19 = vrot.slane %v406_v15, %v1675_v9  ;;  %v410_v26 = vrot.slane %v406_v15, %v1678_v11  ;;  %s1038_s10 = sshll.u32 %s1463_s9, 8  ;;  %s359_s20 = scalar_lea.vmem [#allocation10], %s1637_s18 }
  0x90   : > { %399 = vrot.lane.b32.xlu0 %v1653_v1, %s1382_s11  ;;  %v508_v41 = vsel %vm366_vm12, 1, %v1380_v0  ;;  %v528_v44 = vsel %vm367_vm13, 1, %v1380_v0  ;;  %vm505_vm14 = vcmp.lt.s32.totalorder %v1681_v12, 1  ;;  %v1390_v15 = vmov 1   ;;  %s1391_s11 = smov 32   ;;  %s896_s16 = sshll.u32 %s359_s20, 4  ;;  %s1758_s16 = int_to_ptr.vmem [resolvable:$true] %s896_s16 }
  0x91   : > { %vm396_vm3 = vcmp.eq.s32.totalorder %v394_v13, 1  ;;  %vm395_vm4 = vcmp.eq.s32.totalorder %v390_v14, 1  ;;  %vm416_vm9 = vcmp.eq.s32.totalorder %v414_v19, 1  ;;  %vm415_vm10 = vcmp.eq.s32.totalorder %v410_v26, 1  ;;  %s882_s9 = scalar_lea.sflag [#allocation4], %s317_s14  ;;  %s1296_s18 = scalar_lea.vmem %s1758_s16, 256 }
  0x92   : > { %vm1040_vm7 = vmpackc.low %vm396_vm3, %vm1384_vm6  ;;  %v516_v42 = vrot.slane %v508_v41, %v1675_v9  ;;  %v512_v43 = vrot.slane %v508_v41, %v1678_v11  ;;  %v536_v48 = vrot.slane %v528_v44, %v1675_v9  ;;  %v532_v54 = vrot.slane %v528_v44, %v1678_v11  ;;  %p1297_p8 = scmp.ne.s32.totalorder %s1758_s16, %s1296_s18 }
  0x93   : > { %vm1043_vm8 = vmpackc.low %vm395_vm4, %vm1384_vm6  ;;  %1167 = vset.pattern.permute.xlu1 %v1386_v38  ;;  %v1393_v41 = vmov 4  }
  0x94   : > { %vm518_vm15 = vcmp.eq.s32.totalorder %v516_v42, 1  ;;  %vm517_vm0 = vcmp.eq.s32.totalorder %v512_v43, 1  ;;  %vm538_vm4 = vcmp.eq.s32.totalorder %v536_v48, 1  ;;  %v1394_v42 = vmov 5   ;;  %p1298_p3 = pnand %p1297_p8, %p1584_p6 }
  0x95   : > { %vm1046_vm1 = vmpackc.low %vm518_vm15, %vm1384_vm6 }
  0x96   : > { %vm1049_vm3 = vmpackc.low %vm517_vm0, %vm1384_vm6  ;;  %p1299_p7 = pneg %p1298_p3 }
  0xfd   : > { %v402_v20 = vpop.permute.xlu1 %401 }
  0xfe   : > { %v1158_v16 = vpop.permute.xlu0 %1157 }
  0xff   : > { %v1160_v17 = vunpack.i.h.bf16 %v1158_v16  ;;  %v1159_v18 = vunpack.i.l.bf16 %v1158_v16 }
 0x101   : > { %v384_v21 = vsel %vm383_vm2, %v1159_v18, %v1160_v17  ;;  %v385_v22 = vsel %vm383_vm2, %v1160_v17, %v1159_v18  ;;  %vm525_vm2 = vcmp.lt.s32.totalorder %v1681_v12, 127 }
 0x102   : > { %v1039_v23 = vpack.c.bf16 %v384_v21, %v1655_v2  ;;  %v1042_v24 = vpack.c.bf16 %v385_v22, %v1653_v1  ;;  %v400_v25 = vpop.permute.xlu0 %399 }
 0x103   : > { %v405_v27 = vsel %vm403_vm5, %v402_v20, %v400_v25  ;;  %v404_v28 = vsel %vm403_vm5, %v400_v25, %v402_v20  ;;  %vm537_vm5 = vcmp.eq.s32.totalorder %v532_v54, 1 }
 0x104   : > { %1041 = vmatprep.subr.msk.bf16.mxu0 %vm1040_vm7, %v1039_v23  ;;  %vm368_vm7 = vcmp.ge.s32.totalorder %v1672_v7, 2 }
 0x105   : > { %1044 = vmatpush1.bf16.msk.msra.mxu0 %vm1043_vm8, %v1042_v24  ;;  %vm369_vm8 = vcmp.lt.s32.totalorder %v1672_v7, 14 }
 0x106   : > { %1014 = vmatprep.subr.msk.mxu0 %vm416_vm9, %v405_v27  ;;  %v656_v18 = vsel %vm369_vm8, 1, %v1380_v0  ;;  %vm633_vm9 = vcmp.lt.s32.totalorder %v1681_v12, 32 }
 0x107   : > { %v664_v22 = vrot.slane %v656_v18, %v1675_v9  ;;  %v660_v27 = vrot.slane %v656_v18, %v1678_v11 }
 0x109   : > { %1015 = vmatpush1.msk.msra.mxu0 %vm415_vm10, %v404_v28  ;;  %vm666_vm0 = vcmp.eq.s32.totalorder %v664_v22, 1 }
 0x10a   : > { %1016 = vmatmul.mubr.msk.f32.vlgmr.msra.gmra.mrb[0].mxu0 %vm424_vm11, %v373_v29 }
 0x10b   : > { %740 = vmatprep.mubr.f32.mxu0 %v1381_v3 }
 0x10e   : > { %v422_v30 = vpop.permute.xlu1 %421 }
 0x1dd   : > { %v494_v31 = vpop.f32.mrb[0].mxu0 }
 0x1de   : > { %v495_v32 = vadd.f32 %v494_v31, %v422_v30  ;;  %v496_v33 = vpop.f32.mrb[1].mxu0 }
 0x1df   : > { %v497_v34 = vadd.f32 %v496_v33, %v422_v30  ;;  %v375_v30 = vld [vmem:[%s1806_s5] sm:$0xff] }
 0x1e0   : > { %v499_v35 = vmax.f32 %v495_v32, 0.0 }
 0x1e1   : > { %v500_v36 = vmax.f32 %v497_v34, 0.0 }
 0x1e2   : > { %521 = vrot.lane.b32.xlu1 %v499_v35, %s1385_s25 }
 0x1e3   : > { %v1162_v37 = vpack.i.bf16 %v500_v36, %v499_v35 }
 0x1e5   : > { %1163 = vrot.lane.b32.xlu0 %v1162_v37, %s1388_s17 }
 0x1e6   : > { %616 = vperm.xlu1 %1167, %v1665_v5  }
 0x1e9   : > { %523 = vrot.lane.b32.xlu0 %v500_v36, %s1385_s25 }
 0x1ea   : > { %1174 = vset.pattern.permute.xlu1 %v1390_v15 }
 0x1ed   : > { %622 = vperm.xlu0 %1168, %v1665_v5  }
 0x1f1   : > { %1181 = vset.pattern.permute.xlu0 %v1394_v42 }
 0x254   : > { %v522_v55 = vpop.permute.xlu1 %521 }
 0x257   : > { %v1164_v45 = vpop.permute.xlu0 %1163 }
 0x258   : > { %v1166_v46 = vunpack.i.h.bf16 %v1164_v45  ;;  %v1165_v47 = vunpack.i.l.bf16 %v1164_v45 }
 0x25a   : > { %v506_v49 = vsel %vm505_vm14, %v1165_v47, %v1166_v46  ;;  %v507_v50 = vsel %vm505_vm14, %v1166_v46, %v1165_v47  ;;  %vm653_vm14 = vcmp.lt.s32.totalorder %v1681_v12, 96 }
 0x25b   : > { %v524_v51 = vpop.permute.xlu0 %523  ;;  %v1045_v52 = vpack.c.bf16 %v506_v49, %v500_v36  ;;  %v1048_v53 = vpack.c.bf16 %v507_v50, %v499_v35 }
 0x25c   : > { %v527_v56 = vsel %vm525_vm2, %v524_v51, %v522_v55  ;;  %v526_v58 = vsel %vm525_vm2, %v522_v55, %v524_v51  ;;  %vm370_vm2 = vcmp.ge.s32.totalorder %v1701_v40, 2 }
 0x25d   : > { %1047 = vmatprep.subr.msk.bf16.mxu1 %vm1046_vm1, %v1045_v52  ;;  %vm665_vm1 = vcmp.eq.s32.totalorder %v660_v27, 1  ;;  %v756_v43 = vsel %vm370_vm2, 1, %v1380_v0 }
 0x25e   : > { %1050 = vmatpush1.bf16.msk.msra.mxu1 %vm1049_vm3, %v1048_v53  ;;  %vm371_vm3 = vcmp.lt.s32.totalorder %v1701_v40, 14  ;;  %v764_v44 = vrot.slane %v756_v43, %v1675_v9  ;;  %v760_v45 = vrot.slane %v756_v43, %v1678_v11 }
 0x25f   : > { %1019 = vmatprep.subr.msk.mxu1 %vm538_vm4, %v527_v56  ;;  %v776_v46 = vsel %vm371_vm3, 1, %v1380_v0  ;;  %vm753_vm4 = vcmp.lt.s32.totalorder %v1681_v12, 2 }
 0x262   : > { %1020 = vmatpush1.msk.msra.mxu1 %vm537_vm5, %v526_v58  ;;  %vm766_vm5 = vcmp.eq.s32.totalorder %v764_v44, 1 }
 0x263   : > { %1021 = vmatmul.mubr.msk.f32.vlgmr.msra.gmra.mrb[0].mxu1 %vm424_vm11, %v374_v57  ;;  %vm1058_vm8 = vmpackc.low %vm766_vm5, %vm1384_vm6 }
 0x264   : > { %856 = vmatprep.mubr.f32.mxu1 %v1381_v3  ;;  %v636_v3 = vsel %vm368_vm7, 1, %v1380_v0  ;;  %vm765_vm7 = vcmp.eq.s32.totalorder %v760_v45, 1  ;;  %v780_v0 = vrot.slane %v776_v46, %v1678_v11 }
 0x265   : > { %v617_v59 = vpop.permute.xlu1 %616  ;;  %v644_v16 = vrot.slane %v636_v3, %v1675_v9  ;;  %v640_v17 = vrot.slane %v636_v3, %v1678_v11 }
 0x267   : > { %vm646_vm10 = vcmp.eq.s32.totalorder %v644_v16, 1  ;;  %vm645_vm12 = vcmp.eq.s32.totalorder %v640_v17, 1 }
 0x268   : > { %vm1052_vm13 = vmpackc.low %vm646_vm10, %vm1384_vm6 }
 0x269   : > { %vm1055_vm15 = vmpackc.low %vm645_vm12, %vm1384_vm6 }
 0x26a   : > { %vm1061_vm10 = vmpackc.low %vm765_vm7, %vm1384_vm6 }
 0x26c   : > { %v623_v61 = vpop.permute.xlu0 %622 }
 0x336   : > { %v610_v60 = vpop.f32.mrb[0].mxu1 }
 0x337   : > { %v619_v62 = vmul.f32 %v617_v59, %v610_v60  ;;  %v612_v63 = vpop.f32.mrb[1].mxu1 }
 0x338   : > { %v620_v4 = vmul.f32 %v617_v59, %v612_v63 }
 0x339   : > { %v625_v6 = vadd.f32 %v623_v61, %v619_v62 }
 0x33a   : > { %v626_v8 = vadd.f32 %v623_v61, %v620_v4 }
 0x33b   : > { %v627_v10 = vmax.f32 %v625_v6, 0.0 }
 0x33c   : > { %v628_v13 = vmax.f32 %v626_v8, 0.0 }
 0x33e   : > { %651 = vrot.lane.b32.xlu0 %v628_v13, %s1389_s19  ;;  %v1169_v14 = vpack.i.bf16 %v628_v13, %v627_v10 }
 0x340   : > { %1170 = vrot.lane.b32.xlu1 %v1169_v14, %s1391_s11  ;;  %s1396_s11 = smov [#allocation10]  }
 0x341   : > { %s1300_s13 = sshll.u32 %s1396_s11, 4  ;;  %s1301_s13 = int_to_ptr.vmem [resolvable:$false] %s1300_s13 }
 0x342   : > { %s1302_s21 = scalar_lea.vmem %s1301_s13, 512  ;;  %p1303_p10 = scmp.lt.s32.totalorder %s1758_s16, %s1301_s13 }
 0x343   : > { %p1304_p13 = scmp.lt.s32.totalorder %s1302_s21, %s1296_s18 }
 0x344   : > { %649 = vrot.lane.b32.xlu1 %v627_v10, %s1389_s19  ;;  %s1756_s19 = scalar_lea.hbm %s1809_s8, %s1038_s10 }
 0x345   : > { %p1305_p5 = por %p1304_p13, %p1303_p10 }
 0x347   : > { %p1306_p0 = pnand %p1305_p5, %p1299_p7 }
 0x348   : > { %670 = vperm.xlu1 %1174, %v1665_v5  }
 0x34c   : > { %1180 = vset.pattern.permute.xlu1 %v1393_v41 }
 0x3b0   : > { %v652_v28 = vpop.permute.xlu0 %651 }
 0x3b2   : > { %v1171_v19 = vpop.permute.xlu1 %1170 }
 0x3b3   : > { %v1173_v20 = vunpack.i.h.bf16 %v1171_v19  ;;  %v1172_v21 = vunpack.i.l.bf16 %v1171_v19 }
 0x3b5   : > { %v634_v23 = vsel %vm633_vm9, %v1172_v21, %v1173_v20  ;;  %v635_v24 = vsel %vm633_vm9, %v1173_v20, %v1172_v21  ;;  %vm773_vm9 = vcmp.lt.s32.totalorder %v1681_v12, 126 }
 0x3b6   : > { %v1051_v7 = vpack.c.bf16 %v634_v23, %v628_v13  ;;  %v1054_v25 = vpack.c.bf16 %v635_v24, %v627_v10  ;;  %v650_v26 = vpop.permute.xlu1 %649 }
 0x3b7   : > { %v655_v29 = vsel %vm653_vm14, %v652_v28, %v650_v26  ;;  %v654_v31 = vsel %vm653_vm14, %v650_v26, %v652_v28 }
 0x3b8   : > { %1053 = vmatprep.subr.msk.bf16.mxu0 %vm1052_vm13, %v1051_v7  ;;  %vm785_vm13 = vcmp.eq.s32.totalorder %v780_v0, 1 }
 0x3b9   : > { %1056 = vmatpush1.bf16.msk.msra.mxu0 %vm1055_vm15, %v1054_v25 }
 0x3ba   : > { %1024 = vmatprep.subr.msk.mxu0 %vm666_vm0, %v655_v29 }
 0x3bd   : > { %1025 = vmatpush1.msk.msra.mxu0 %vm665_vm1, %v654_v31 }
 0x3be   : > { %1026 = vmatmul.mubr.msk.f32.vlgmr.msra.gmra.mrb[2].mxu0 %vm424_vm11, %v375_v30 }
 0x3c7   : > { %v671_v32 = vpop.permute.xlu1 %670 }
 0x491   : > { %v742_v33 = vpop.f32.mrb[2].mxu0 }
 0x492   : > { %v743_v34 = vadd.f32 %v742_v33, %v671_v32  ;;  %v744_v35 = vpop.f32.mrb[3].mxu0 }
 0x493   : > { %v745_v36 = vadd.f32 %v744_v35, %v671_v32 }
 0x494   : > { %v747_v37 = vmax.f32 %v743_v34, 0.0 }
 0x495   : > { %v748_v38 = vmax.f32 %v745_v36, 0.0 }
 0x496   : > { %769 = vrot.lane.b32.xlu1 %v747_v37, %s1392_s15 }
 0x497   : > { %v1175_v39 = vpack.i.bf16 %v748_v38, %v747_v37 }
 0x499   : > { %1176 = vrot.lane.b32.xlu0 %v1175_v39, %s1395_s24 }
 0x49a   : > { %864 = vperm.xlu1 %1180, %v1665_v5  }
 0x49d   : > { %771 = vrot.lane.b32.xlu0 %v748_v38, %s1392_s15 }
 0x4a1   : > { %870 = vperm.xlu0 %1181, %v1665_v5   ;;  %v784_v5 = vrot.slane %v776_v46, %v1675_v9  ;;  %v376_v9 = vld [vmem:[#allocation8] sm:$0xff] }
 0x4a3   : > { %vm786_vm12 = vcmp.eq.s32.totalorder %v784_v5, 1 }
 0x508   : > { %v770_v54 = vpop.permute.xlu1 %769 }
 0x50b   : > { %v1177_v47 = vpop.permute.xlu0 %1176 }
 0x50c   : > { %v1179_v48 = vunpack.i.h.bf16 %v1177_v47  ;;  %v1178_v49 = vunpack.i.l.bf16 %v1177_v47 }
 0x50e   : > { %v754_v50 = vsel %vm753_vm4, %v1178_v49, %v1179_v48  ;;  %v755_v51 = vsel %vm753_vm4, %v1179_v48, %v1178_v49 }
 0x50f   : > { %v1057_v40 = vpack.c.bf16 %v754_v50, %v748_v38  ;;  %v1060_v52 = vpack.c.bf16 %v755_v51, %v747_v37  ;;  %v772_v53 = vpop.permute.xlu0 %771 }
 0x510   : > { %v775_v55 = vsel %vm773_vm9, %v772_v53, %v770_v54  ;;  %v774_v56 = vsel %vm773_vm9, %v770_v54, %v772_v53 }
 0x511   : > { %1059 = vmatprep.subr.msk.bf16.mxu1 %vm1058_vm8, %v1057_v40 }
 0x512   : > { %1062 = vmatpush1.bf16.msk.msra.mxu1 %vm1061_vm10, %v1060_v52 }
 0x513   : > { %1029 = vmatprep.subr.msk.mxu1 %vm786_vm12, %v775_v55 }
 0x516   : > { %1030 = vmatpush1.msk.msra.mxu1 %vm785_vm13, %v774_v56 }
 0x517   : > { %1031 = vmatmul.mubr.msk.f32.vlgmr.msra.gmra.mrb[2].mxu1 %vm424_vm11, %v376_v9 }
 0x519   : > { %v865_v12 = vpop.permute.xlu1 %864 }
 0x520   : > { %v871_v58 = vpop.permute.xlu0 %870 }
 0x5ea   : > { %v858_v57 = vpop.f32.mrb[2].mxu1 }
 0x5eb   : > { %v867_v59 = vmul.f32 %v865_v12, %v858_v57  ;;  %v860_v11 = vpop.f32.mrb[3].mxu1 }
 0x5ec   : > { %v868_v60 = vmul.f32 %v865_v12, %v860_v11 }
 0x5ed   : > { %v873_v61 = vadd.f32 %v871_v58, %v867_v59 }
 0x5ee   : > { %v874_v62 = vadd.f32 %v871_v58, %v868_v60 }
 0x5ef   : > { %v875_v63 = vadd.f32 %v873_v61, %v1653_v1 }
 0x5f0   : > { %v876_v4 = vadd.f32 %v874_v62, %v1655_v2 }
 0x5f1   : > { %v877_v6 = vmax.f32 %v875_v63, 0.0 }
 0x5f2   : > { %v878_v8 = vmax.f32 %v876_v4, 0.0 }
 0x5f3   : > { %879 = vst [vmem:[%s359_s20] sm:$0xff] %v877_v6 }
 0x5f4   : > { %880 = vst [vmem:[%s359_s20 + $0x8] sm:$0xff] %v878_v8 }
 0x5f5   : > { %1309 = shalt.err (!%p1306_p0)
}
 0x5f6   : > { %s1310_s14 = scalar_lea.hbm %s1756_s19, 256  ;;  %s1314_s10 = scalar_lea.hbm %s1809_s8, 512 }
 0x5f7   : > { %p1311_p9 = scmp.ne.s32.totalorder %s1756_s19, %s1310_s14  ;;  %p1315_p2 = scmp.lt.u32.totalorder %s1756_s19, %s1809_s8 }
 0x5f8   : > { %p1316_p1 = scmp.lt.u32.totalorder %s1314_s10, %s1310_s14  ;;  %p1318_p8 = scmp.lt.u32.totalorder %s1310_s14, %s1756_s19 }
 0x5f9   : > { %p1312_p11 = pnand %p1311_p9, %p1584_p6 }
 0x5fa   : > { %p1317_p4 = por %p1316_p1, %p1315_p2 }
 0x5fb   : > { %p1313_p12 = pneg %p1312_p11 }
 0x5fc   : > { %p1319_p3 = por %p1318_p8, %p1317_p4 }
 0x5fe   : > { %p1320_p7 = pnand %p1319_p3, %p1313_p12 }
 0x600   : > { %1323 = shalt.err (!%p1320_p7)
}
 0x601   : > { %1077 = dma.vmem_to_hbm [thread:$0]  (%p1584_p6), %s1758_s16, 256, %s1756_s19, %s882_s9  }
 0x602 PF: > { %s908_s17 = sand.u32 1, %s1362_s27   ;;  %p1829_p10 = scmp.ne.s32.totalorder %s1814_s12, 0 }
 0x603   : > { %p1830_p13 = scmp.ge.s32.totalorder %s1374_s30, 2  ;;  %s909_s18 = scalar_lea.sflag [#allocation4], %s908_s17 }
 0x605   : > { %p1094_p5 = pnand %p1830_p13, %p1829_p10 }
 0x607   : > { %1357 = dma.done.wait (!%p1094_p5), %s909_s18, 256  }
 0x608   : > { %1359 = vsyncadd (!%p1094_p5), %s909_s18, 4294967040  ;;  %p23_p0 = scmp.ge.s32.totalorder %s1570_s26, 4   ;;  %s1831_s27 = smov %s1366_s28 }
 0x609   : > { %s1832_s28 = smov %s1370_s29  ;;  %s1833_s29 = smov %s1580_s22 }
 0x60a   : > { %s1834_s30 = smov %s1570_s26  ;;  %25 = sbr.rel (!%p23_p0) target bundleno = 7 (0x7), region = 110 }
 0x611   :  { %914 = vsyncpa [#allocation3], 1 }
 0x612   :  { %916 = vsyncpa [#allocation3 + $0x1], 1 }
 0x613   :  { %917 = vsyncpa [#allocation6], 1 }
 0x614   :  { %919 = vsyncpa [#allocation6 + $0x1], 1 }
 0x615   :  { %920 = vsyncpa [#allocation9], 1 }
 0x616   :  { %921 = vsyncpa [#allocation4], 1 }
 0x617   :  { %923 = vsyncpa [#allocation4 + $0x1], 1 }

</bundles_post_ra>
